<compile_context>
chip_gen: v7x
topology: tpu7x:2x2x1
jax: 0.10.0
libtpu: 0.0.40
codegen_flags: <defaults>
</compile_context>

<pallas_src>
import functools

import jax
import jax.numpy as jnp
import numpy as np
from jax.experimental import pallas as pl
from jax.experimental.pallas import tpu as pltpu


def _dwconv_pw_kernel(x_ref, dww_ref, dwb_ref, pww_ref, pwb_ref, o_ref, *, H, W):
    """One batch element, spatially flattened (lane-dense) layout.

    x_ref:   (1, Cin, HW + 2*(W+1))  flattened image with a (W+1)-zero halo at both ends
    dww_ref: (Cin, 9)                depthwise 3x3 taps (BN1 scale folded in), t = dy*3+dx
    dwb_ref: (Cin, 1)                folded BN1 shift
    pww_ref: (Cout, Cin)             pointwise 1x1 weights (BN2 scale folded in)
    pwb_ref: (Cout, 1)               folded BN2 shift
    o_ref:   (1, Cout, HW)           conv output, NC(HW) layout (lane-dense, 256 lanes)
    """
    Cin = x_ref.shape[1]
    Cout, HW = o_ref.shape[1], o_ref.shape[2]
    Wp = W + 1

    xp = x_ref[0].astype(jnp.float32)          # (Cin, HW + 2*(W+1))
    dww = dww_ref[...].astype(jnp.float32)     # (Cin, 9)
    pww = pww_ref[...].astype(jnp.float32)     # (Cout, Cin)

    # lane index -> w coordinate (for masking the W wrap-around of the flattened shift)
    lane = jax.lax.broadcasted_iota(jnp.int32, (1, HW), 1)
    ww = lane % W

    # --- depthwise 3x3 conv (BN1 scale pre-folded into the taps) ----------------
    acc = jnp.zeros((Cin, HW), jnp.float32)
    for dy in range(3):
        for dx in range(3):
            oy, ox = dy - 1, dx - 1
            s = oy * W + ox                                  # flattened tap shift
            shifted = xp[:, Wp + s: Wp + s + HW]             # static lane slice (Cin, HW)
            if ox != 0:                                      # kill row wrap-around
                valid = (ww + ox >= 0) & (ww + ox < W)
                shifted = jnp.where(valid, shifted, 0.0)
            tap = dww[:, dy * 3 + dx: dy * 3 + dx + 1]       # (Cin, 1) -> lane broadcast
            acc = acc + shifted * tap

    y = acc + dwb_ref[...]                                   # folded BN1 shift
    y = jnp.where(y >= 0, y, 0.1 * y)                        # LeakyReLU(0.1)

    # --- pointwise 1x1 conv as Cin broadcast-FMAs on the VPU --------------------
    out = jnp.zeros((Cout, HW), jnp.float32)
    for c in range(Cin):
        out = out + pww[:, c:c + 1] * y[c:c + 1, :]          # (Cout,1)*(1,HW) outer FMA
    out = out + pwb_ref[...]                                 # folded BN2 shift
    out = jnp.where(out >= 0, out, 0.1 * out)                # LeakyReLU(0.1)

    o_ref[0] = out.astype(o_ref.dtype)


def custom_pixel_shuffle_icnr(x_nchw, params, *, nf, scale, blur=False):
    """Forward of CustomPixelShuffle_ICNR.

    x_nchw: (N, ni, H, W) float32.  Returns (N, nf, H*scale, W*scale) float32.
    params: (dw_w_eff (Cin,9), dw_b (Cin,1), pw_w_eff (Cout,Cin), pw_b (Cout,1)),
            with eval-mode BN scales already folded into the weights (see fold_params).
    """
    if blur:
        # TODO(synk): blur=True (ReplicationPad2d + AvgPool2d) not implemented.
        raise NotImplementedError("blur=True path is not implemented")

    dw_w, dw_b, pw_w, pw_b = params
    N, Cin, H, W = x_nchw.shape
    r = scale
    Cout = nf * r * r
    HW = H * W
    Wp = W + 1
    L = HW + 2 * Wp

    assert pw_w.shape == (Cout, Cin)

    # Flatten spatial dims (free bitcast) and add a (W+1)-zero halo on the flattened
    # axis so every 3x3 tap is a static lane slice in the kernel.  No transpose, no
    # 2-D spatial pad.
    x_flat = jnp.pad(x_nchw.reshape(N, Cin, HW), ((0, 0), (0, 0), (Wp, Wp)))

    conv = pl.pallas_call(
        functools.partial(_dwconv_pw_kernel, H=H, W=W),
        out_shape=jax.ShapeDtypeStruct((N, Cout, HW), jnp.float32),
        grid_spec=pltpu.PrefetchScalarGridSpec(
            num_scalar_prefetch=0,
            grid=(N,),
            in_specs=[
                pl.BlockSpec((1, Cin, L), lambda n: (n, 0, 0)),
                pl.BlockSpec((Cin, 9), lambda n: (0, 0)),
                pl.BlockSpec((Cin, 1), lambda n: (0, 0)),
                pl.BlockSpec((Cout, Cin), lambda n: (0, 0)),
                pl.BlockSpec((Cout, 1), lambda n: (0, 0)),
            ],
            out_specs=pl.BlockSpec((1, Cout, HW), lambda n: (n, 0, 0)),
        ),
        compiler_params=pltpu.CompilerParams(
            dimension_semantics=("parallel",)),
    )(x_flat, dw_w, dw_b, pw_w, pw_b)

    # (N, Cout, H*W) is bitwise NCHW conv output; pixel shuffle in the wrapper.
    y = conv.reshape(N, nf, r, r, H, W)
    y = jnp.transpose(y, (0, 1, 4, 2, 5, 3))          # (N, nf, H, r, W, r)
    return y.reshape(N, nf, H * r, W * r)


def make_params(key, ni, nf, scale):
    """Deterministic synthetic raw parameters (PyTorch-module-equivalent)."""
    Cout = nf * scale * scale
    keys = jax.random.split(key, 10)
    dw_w = 0.2 * jax.random.normal(keys[0], (ni, 3, 3), jnp.float32)       # depthwise (C,3,3)
    g1 = 1.0 + 0.1 * jax.random.normal(keys[1], (ni,), jnp.float32)
    b1 = 0.05 * jax.random.normal(keys[2], (ni,), jnp.float32)
    m1 = 0.05 * jax.random.normal(keys[3], (ni,), jnp.float32)
    v1 = 1.0 + 0.1 * jax.nn.sigmoid(jax.random.normal(keys[4], (ni,), jnp.float32))
    pw_w = 0.2 * jax.random.normal(keys[5], (Cout, ni), jnp.float32)       # pointwise (Cout,C)
    g2 = 1.0 + 0.1 * jax.random.normal(keys[6], (Cout,), jnp.float32)
    b2 = 0.05 * jax.random.normal(keys[7], (Cout,), jnp.float32)
    m2 = 0.05 * jax.random.normal(keys[8], (Cout,), jnp.float32)
    v2 = 1.0 + 0.1 * jax.nn.sigmoid(jax.random.normal(keys[9], (Cout,), jnp.float32))
    return {"dw_w": dw_w, "bn1": (g1, b1, m1, v1), "pw_w": pw_w, "bn2": (g2, b2, m2, v2)}


def fold_params(raw, eps=1e-5):
    """Fold eval-mode BN scales into the conv weights; keep additive shifts separate."""
    dw_w = raw["dw_w"]                     # (C, 3, 3)
    g1, b1, m1, v1 = raw["bn1"]
    pw_w = raw["pw_w"]                     # (Cout, C)
    g2, b2, m2, v2 = raw["bn2"]
    C = dw_w.shape[0]
    Cout = pw_w.shape[0]

    s1 = g1 / jnp.sqrt(v1 + eps)                               # (C,)
    dw_w_eff = (dw_w * s1[:, None, None]).reshape(C, 9)        # (C, 9), t = dy*3+dx
    dw_b = (b1 - m1 * s1).reshape(C, 1)

    s2 = g2 / jnp.sqrt(v2 + eps)                               # (Cout,)
    pw_w_eff = pw_w * s2[:, None]                              # (Cout, C)
    pw_b = (b2 - m2 * s2).reshape(Cout, 1)
    return dw_w_eff, dw_b, pw_w_eff, pw_b


def reference(x_nchw, raw, *, nf, scale, eps=1e-5):
    """Pure-JAX reference (lax convs + explicit eval-mode BN) for verification."""
    dw_w = raw["dw_w"]                     # (C, 3, 3)
    g1, b1, m1, v1 = raw["bn1"]
    pw_w = raw["pw_w"]                     # (Cout, C)
    g2, b2, m2, v2 = raw["bn2"]
    N, C, H, W = x_nchw.shape
    Cout = pw_w.shape[0]

    y = jax.lax.conv_general_dilated(
        x_nchw, dw_w[:, None, :, :], (1, 1), "SAME", feature_group_count=C,
        dimension_numbers=("NCHW", "OIHW", "NCHW"))
    y = (y - m1.reshape(1, C, 1, 1)) * (g1 / jnp.sqrt(v1 + eps)).reshape(1, C, 1, 1) \
        + b1.reshape(1, C, 1, 1)
    y = jnp.where(y >= 0, y, 0.1 * y)

    y = jax.lax.conv_general_dilated(
        y, pw_w[:, :, None, None], (1, 1), "SAME",
        dimension_numbers=("NCHW", "OIHW", "NCHW"))
    y = (y - m2.reshape(1, Cout, 1, 1)) * (g2 / jnp.sqrt(v2 + eps)).reshape(1, Cout, 1, 1) \
        + b2.reshape(1, Cout, 1, 1)
    y = jnp.where(y >= 0, y, 0.1 * y)

    r = scale
    y = y.reshape(N, nf, r, r, H, W)
    y = jnp.transpose(y, (0, 1, 4, 2, 5, 3))
    return y.reshape(N, nf, H * r, W * r)


if __name__ == "__main__":
    # small shapes consistent with the module: ni=4, nf=4, scale=2
    N, ni, H, W = 2, 4, 16, 16
    nf, scale = 4, 2

    key = jax.random.PRNGKey(0)
    kx, kp = jax.random.split(key)
    x = jax.random.normal(kx, (N, ni, H, W), jnp.float32)
    raw = make_params(kp, ni, nf, scale)
    kparams = fold_params(raw)

    fwd = jax.jit(functools.partial(custom_pixel_shuffle_icnr, nf=nf, scale=scale))
    out = jax.block_until_ready(fwd(x, kparams))

    ref = jax.block_until_ready(reference(x, raw, nf=nf, scale=scale))
    assert out.shape == (N, nf, H * scale, W * scale), out.shape
    np.testing.assert_allclose(np.asarray(out), np.asarray(ref), rtol=1e-4, atol=1e-4)

    print("KERNEL_OK")
</pallas_src>

<mosaic_0001>
module attributes {stable_mosaic.version = 11 : i64} {
  func.func @_dwconv_pw_kernel(%arg0: i32, %arg1: memref<1x4x290xf32, #tpu.memory_space<vmem>>, %arg2: memref<4x9xf32, #tpu.memory_space<vmem>>, %arg3: memref<4x1xf32, #tpu.memory_space<vmem>>, %arg4: memref<16x4xf32, #tpu.memory_space<vmem>>, %arg5: memref<16x1xf32, #tpu.memory_space<vmem>>, %arg6: memref<1x16x256xf32, #tpu.memory_space<vmem>>) attributes {dimension_semantics = [#tpu.dimension_semantics<parallel>], iteration_bounds = array<i64: 2>, scalar_prefetch = 0 : i64, scratch_operands = 0 : i64, tpu.core_type = #tpu.core_type<tc>, window_params = [{transform_indices = @transform_0, window_bounds = array<i64: 1, 4, 290>}, {pipeline_mode = #tpu.pipeline_mode<synchronous>, transform_indices = @transform_1, window_bounds = array<i64: 4, 9>}, {pipeline_mode = #tpu.pipeline_mode<synchronous>, transform_indices = @transform_2, window_bounds = array<i64: 4, 1>}, {pipeline_mode = #tpu.pipeline_mode<synchronous>, transform_indices = @transform_3, window_bounds = array<i64: 16, 4>}, {pipeline_mode = #tpu.pipeline_mode<synchronous>, transform_indices = @transform_4, window_bounds = array<i64: 16, 1>}, {transform_indices = @transform_5, window_bounds = array<i64: 1, 16, 256>}]} {
    %c0 = arith.constant 0 : index
    %c0_0 = arith.constant 0 : index
    %c0_1 = arith.constant 0 : index
    %0 = vector.load %arg1[%c0, %c0_0, %c0_1] : memref<1x4x290xf32, #tpu.memory_space<vmem>>, vector<1x4x290xf32>
    %1 = vector.shape_cast %0 : vector<1x4x290xf32> to vector<4x290xf32>
    %c0_2 = arith.constant 0 : index
    %c0_3 = arith.constant 0 : index
    %2 = vector.load %arg2[%c0_2, %c0_3] : memref<4x9xf32, #tpu.memory_space<vmem>>, vector<4x9xf32>
    %c0_4 = arith.constant 0 : index
    %c0_5 = arith.constant 0 : index
    %3 = vector.load %arg4[%c0_4, %c0_5] : memref<16x4xf32, #tpu.memory_space<vmem>>, vector<16x4xf32>
    %4 = tpu.iota {dimensions = array<i32: 1>} : vector<1x256xi32>
    %c16_i32 = arith.constant 16 : i32
    %c0_i32 = arith.constant 0 : i32
    %5 = arith.cmpi eq, %c16_i32, %c0_i32 : i32
    %c1_i32 = arith.constant 1 : i32
    %6 = arith.select %5, %c1_i32, %c16_i32 : i32
    %7 = vector.broadcast %6 : i32 to vector<1x256xi32>
    %8 = arith.remsi %4, %7 : vector<1x256xi32>
    %c0_i32_6 = arith.constant 0 : i32
    %9 = vector.broadcast %c0_i32_6 : i32 to vector<1x256xi32>
    %10 = arith.cmpi ne, %8, %9 : vector<1x256xi32>
    %c0_i32_7 = arith.constant 0 : i32
    %11 = vector.broadcast %c0_i32_7 : i32 to vector<1x256xi32>
    %12 = arith.cmpi slt, %8, %11 : vector<1x256xi32>
    %c0_i32_8 = arith.constant 0 : i32
    %13 = arith.cmpi slt, %6, %c0_i32_8 : i32
    %14 = vector.broadcast %13 : i1 to vector<1x256xi1>
    %15 = vector.broadcast %14 : vector<1x256xi1> to vector<1x256xi1>
    %16 = arith.xori %12, %15 : vector<1x256xi1>
    %17 = arith.andi %16, %10 : vector<1x256xi1>
    %18 = vector.broadcast %6 : i32 to vector<1x256xi32>
    %19 = arith.addi %8, %18 : vector<1x256xi32>
    %20 = arith.select %17, %19, %8 : vector<1x256xi1>, vector<1x256xi32>
    %cst = arith.constant 0.000000e+00 : f32
    %21 = vector.broadcast %cst : f32 to vector<4x256xf32>
    %22 = vector.extract_strided_slice %1 {offsets = [0, 0], sizes = [4, 256], strides = [1, 1]} : vector<4x290xf32> to vector<4x256xf32>
    %c-1_i32 = arith.constant -1 : i32
    %23 = vector.broadcast %c-1_i32 : i32 to vector<1x256xi32>
    %24 = arith.addi %20, %23 : vector<1x256xi32>
    %c0_i32_9 = arith.constant 0 : i32
    %25 = vector.broadcast %c0_i32_9 : i32 to vector<1x256xi32>
    %26 = arith.cmpi sge, %24, %25 : vector<1x256xi32>
    %c-1_i32_10 = arith.constant -1 : i32
    %27 = vector.broadcast %c-1_i32_10 : i32 to vector<1x256xi32>
    %28 = arith.addi %20, %27 : vector<1x256xi32>
    %c16_i32_11 = arith.constant 16 : i32
    %29 = vector.broadcast %c16_i32_11 : i32 to vector<1x256xi32>
    %30 = arith.cmpi slt, %28, %29 : vector<1x256xi32>
    %31 = arith.andi %26, %30 : vector<1x256xi1>
    %cst_12 = arith.constant 0.000000e+00 : f32
    %32 = vector.shape_cast %31 : vector<1x256xi1> to vector<1x256xi1>
    %33 = vector.broadcast %32 : vector<1x256xi1> to vector<4x256xi1>
    %34 = vector.broadcast %cst_12 : f32 to vector<4x256xf32>
    %35 = arith.select %33, %22, %34 : vector<4x256xi1>, vector<4x256xf32>
    %36 = vector.extract_strided_slice %2 {offsets = [0, 0], sizes = [4, 1], strides = [1, 1]} : vector<4x9xf32> to vector<4x1xf32>
    %37 = vector.broadcast %36 : vector<4x1xf32> to vector<4x256xf32>
    %38 = arith.mulf %35, %37 : vector<4x256xf32>
    %39 = arith.addf %21, %38 : vector<4x256xf32>
    %40 = vector.extract_strided_slice %1 {offsets = [0, 1], sizes = [4, 256], strides = [1, 1]} : vector<4x290xf32> to vector<4x256xf32>
    %41 = vector.extract_strided_slice %2 {offsets = [0, 1], sizes = [4, 1], strides = [1, 1]} : vector<4x9xf32> to vector<4x1xf32>
    %42 = vector.broadcast %41 : vector<4x1xf32> to vector<4x256xf32>
    %43 = arith.mulf %40, %42 : vector<4x256xf32>
    %44 = arith.addf %39, %43 : vector<4x256xf32>
    %45 = vector.extract_strided_slice %1 {offsets = [0, 2], sizes = [4, 256], strides = [1, 1]} : vector<4x290xf32> to vector<4x256xf32>
    %c1_i32_13 = arith.constant 1 : i32
    %46 = vector.broadcast %c1_i32_13 : i32 to vector<1x256xi32>
    %47 = arith.addi %20, %46 : vector<1x256xi32>
    %c0_i32_14 = arith.constant 0 : i32
    %48 = vector.broadcast %c0_i32_14 : i32 to vector<1x256xi32>
    %49 = arith.cmpi sge, %47, %48 : vector<1x256xi32>
    %c1_i32_15 = arith.constant 1 : i32
    %50 = vector.broadcast %c1_i32_15 : i32 to vector<1x256xi32>
    %51 = arith.addi %20, %50 : vector<1x256xi32>
    %c16_i32_16 = arith.constant 16 : i32
    %52 = vector.broadcast %c16_i32_16 : i32 to vector<1x256xi32>
    %53 = arith.cmpi slt, %51, %52 : vector<1x256xi32>
    %54 = arith.andi %49, %53 : vector<1x256xi1>
    %cst_17 = arith.constant 0.000000e+00 : f32
    %55 = vector.shape_cast %54 : vector<1x256xi1> to vector<1x256xi1>
    %56 = vector.broadcast %55 : vector<1x256xi1> to vector<4x256xi1>
    %57 = vector.broadcast %cst_17 : f32 to vector<4x256xf32>
    %58 = arith.select %56, %45, %57 : vector<4x256xi1>, vector<4x256xf32>
    %59 = vector.extract_strided_slice %2 {offsets = [0, 2], sizes = [4, 1], strides = [1, 1]} : vector<4x9xf32> to vector<4x1xf32>
    %60 = vector.broadcast %59 : vector<4x1xf32> to vector<4x256xf32>
    %61 = arith.mulf %58, %60 : vector<4x256xf32>
    %62 = arith.addf %44, %61 : vector<4x256xf32>
    %63 = vector.extract_strided_slice %1 {offsets = [0, 16], sizes = [4, 256], strides = [1, 1]} : vector<4x290xf32> to vector<4x256xf32>
    %c-1_i32_18 = arith.constant -1 : i32
    %64 = vector.broadcast %c-1_i32_18 : i32 to vector<1x256xi32>
    %65 = arith.addi %20, %64 : vector<1x256xi32>
    %c0_i32_19 = arith.constant 0 : i32
    %66 = vector.broadcast %c0_i32_19 : i32 to vector<1x256xi32>
    %67 = arith.cmpi sge, %65, %66 : vector<1x256xi32>
    %c-1_i32_20 = arith.constant -1 : i32
    %68 = vector.broadcast %c-1_i32_20 : i32 to vector<1x256xi32>
    %69 = arith.addi %20, %68 : vector<1x256xi32>
    %c16_i32_21 = arith.constant 16 : i32
    %70 = vector.broadcast %c16_i32_21 : i32 to vector<1x256xi32>
    %71 = arith.cmpi slt, %69, %70 : vector<1x256xi32>
    %72 = arith.andi %67, %71 : vector<1x256xi1>
    %cst_22 = arith.constant 0.000000e+00 : f32
    %73 = vector.shape_cast %72 : vector<1x256xi1> to vector<1x256xi1>
    %74 = vector.broadcast %73 : vector<1x256xi1> to vector<4x256xi1>
    %75 = vector.broadcast %cst_22 : f32 to vector<4x256xf32>
    %76 = arith.select %74, %63, %75 : vector<4x256xi1>, vector<4x256xf32>
    %77 = vector.extract_strided_slice %2 {offsets = [0, 3], sizes = [4, 1], strides = [1, 1]} : vector<4x9xf32> to vector<4x1xf32>
    %78 = vector.broadcast %77 : vector<4x1xf32> to vector<4x256xf32>
    %79 = arith.mulf %76, %78 : vector<4x256xf32>
    %80 = arith.addf %62, %79 : vector<4x256xf32>
    %81 = vector.extract_strided_slice %1 {offsets = [0, 17], sizes = [4, 256], strides = [1, 1]} : vector<4x290xf32> to vector<4x256xf32>
    %82 = vector.extract_strided_slice %2 {offsets = [0, 4], sizes = [4, 1], strides = [1, 1]} : vector<4x9xf32> to vector<4x1xf32>
    %83 = vector.broadcast %82 : vector<4x1xf32> to vector<4x256xf32>
    %84 = arith.mulf %81, %83 : vector<4x256xf32>
    %85 = arith.addf %80, %84 : vector<4x256xf32>
    %86 = vector.extract_strided_slice %1 {offsets = [0, 18], sizes = [4, 256], strides = [1, 1]} : vector<4x290xf32> to vector<4x256xf32>
    %c1_i32_23 = arith.constant 1 : i32
    %87 = vector.broadcast %c1_i32_23 : i32 to vector<1x256xi32>
    %88 = arith.addi %20, %87 : vector<1x256xi32>
    %c0_i32_24 = arith.constant 0 : i32
    %89 = vector.broadcast %c0_i32_24 : i32 to vector<1x256xi32>
    %90 = arith.cmpi sge, %88, %89 : vector<1x256xi32>
    %c1_i32_25 = arith.constant 1 : i32
    %91 = vector.broadcast %c1_i32_25 : i32 to vector<1x256xi32>
    %92 = arith.addi %20, %91 : vector<1x256xi32>
    %c16_i32_26 = arith.constant 16 : i32
    %93 = vector.broadcast %c16_i32_26 : i32 to vector<1x256xi32>
    %94 = arith.cmpi slt, %92, %93 : vector<1x256xi32>
    %95 = arith.andi %90, %94 : vector<1x256xi1>
    %cst_27 = arith.constant 0.000000e+00 : f32
    %96 = vector.shape_cast %95 : vector<1x256xi1> to vector<1x256xi1>
    %97 = vector.broadcast %96 : vector<1x256xi1> to vector<4x256xi1>
    %98 = vector.broadcast %cst_27 : f32 to vector<4x256xf32>
    %99 = arith.select %97, %86, %98 : vector<4x256xi1>, vector<4x256xf32>
    %100 = vector.extract_strided_slice %2 {offsets = [0, 5], sizes = [4, 1], strides = [1, 1]} : vector<4x9xf32> to vector<4x1xf32>
    %101 = vector.broadcast %100 : vector<4x1xf32> to vector<4x256xf32>
    %102 = arith.mulf %99, %101 : vector<4x256xf32>
    %103 = arith.addf %85, %102 : vector<4x256xf32>
    %104 = vector.extract_strided_slice %1 {offsets = [0, 32], sizes = [4, 256], strides = [1, 1]} : vector<4x290xf32> to vector<4x256xf32>
    %c-1_i32_28 = arith.constant -1 : i32
    %105 = vector.broadcast %c-1_i32_28 : i32 to vector<1x256xi32>
    %106 = arith.addi %20, %105 : vector<1x256xi32>
    %c0_i32_29 = arith.constant 0 : i32
    %107 = vector.broadcast %c0_i32_29 : i32 to vector<1x256xi32>
    %108 = arith.cmpi sge, %106, %107 : vector<1x256xi32>
    %c-1_i32_30 = arith.constant -1 : i32
    %109 = vector.broadcast %c-1_i32_30 : i32 to vector<1x256xi32>
    %110 = arith.addi %20, %109 : vector<1x256xi32>
    %c16_i32_31 = arith.constant 16 : i32
    %111 = vector.broadcast %c16_i32_31 : i32 to vector<1x256xi32>
    %112 = arith.cmpi slt, %110, %111 : vector<1x256xi32>
    %113 = arith.andi %108, %112 : vector<1x256xi1>
    %cst_32 = arith.constant 0.000000e+00 : f32
    %114 = vector.shape_cast %113 : vector<1x256xi1> to vector<1x256xi1>
    %115 = vector.broadcast %114 : vector<1x256xi1> to vector<4x256xi1>
    %116 = vector.broadcast %cst_32 : f32 to vector<4x256xf32>
    %117 = arith.select %115, %104, %116 : vector<4x256xi1>, vector<4x256xf32>
    %118 = vector.extract_strided_slice %2 {offsets = [0, 6], sizes = [4, 1], strides = [1, 1]} : vector<4x9xf32> to vector<4x1xf32>
    %119 = vector.broadcast %118 : vector<4x1xf32> to vector<4x256xf32>
    %120 = arith.mulf %117, %119 : vector<4x256xf32>
    %121 = arith.addf %103, %120 : vector<4x256xf32>
    %122 = vector.extract_strided_slice %1 {offsets = [0, 33], sizes = [4, 256], strides = [1, 1]} : vector<4x290xf32> to vector<4x256xf32>
    %123 = vector.extract_strided_slice %2 {offsets = [0, 7], sizes = [4, 1], strides = [1, 1]} : vector<4x9xf32> to vector<4x1xf32>
    %124 = vector.broadcast %123 : vector<4x1xf32> to vector<4x256xf32>
    %125 = arith.mulf %122, %124 : vector<4x256xf32>
    %126 = arith.addf %121, %125 : vector<4x256xf32>
    %127 = vector.extract_strided_slice %1 {offsets = [0, 34], sizes = [4, 256], strides = [1, 1]} : vector<4x290xf32> to vector<4x256xf32>
    %c1_i32_33 = arith.constant 1 : i32
    %128 = vector.broadcast %c1_i32_33 : i32 to vector<1x256xi32>
    %129 = arith.addi %20, %128 : vector<1x256xi32>
    %c0_i32_34 = arith.constant 0 : i32
    %130 = vector.broadcast %c0_i32_34 : i32 to vector<1x256xi32>
    %131 = arith.cmpi sge, %129, %130 : vector<1x256xi32>
    %c1_i32_35 = arith.constant 1 : i32
    %132 = vector.broadcast %c1_i32_35 : i32 to vector<1x256xi32>
    %133 = arith.addi %20, %132 : vector<1x256xi32>
    %c16_i32_36 = arith.constant 16 : i32
    %134 = vector.broadcast %c16_i32_36 : i32 to vector<1x256xi32>
    %135 = arith.cmpi slt, %133, %134 : vector<1x256xi32>
    %136 = arith.andi %131, %135 : vector<1x256xi1>
    %cst_37 = arith.constant 0.000000e+00 : f32
    %137 = vector.shape_cast %136 : vector<1x256xi1> to vector<1x256xi1>
    %138 = vector.broadcast %137 : vector<1x256xi1> to vector<4x256xi1>
    %139 = vector.broadcast %cst_37 : f32 to vector<4x256xf32>
    %140 = arith.select %138, %127, %139 : vector<4x256xi1>, vector<4x256xf32>
    %141 = vector.extract_strided_slice %2 {offsets = [0, 8], sizes = [4, 1], strides = [1, 1]} : vector<4x9xf32> to vector<4x1xf32>
    %142 = vector.broadcast %141 : vector<4x1xf32> to vector<4x256xf32>
    %143 = arith.mulf %140, %142 : vector<4x256xf32>
    %144 = arith.addf %126, %143 : vector<4x256xf32>
    %c0_38 = arith.constant 0 : index
    %c0_39 = arith.constant 0 : index
    %145 = vector.load %arg3[%c0_38, %c0_39] : memref<4x1xf32, #tpu.memory_space<vmem>>, vector<4x1xf32>
    %146 = vector.broadcast %145 : vector<4x1xf32> to vector<4x256xf32>
    %147 = arith.addf %144, %146 : vector<4x256xf32>
    %cst_40 = arith.constant 0.000000e+00 : f32
    %148 = vector.broadcast %cst_40 : f32 to vector<4x256xf32>
    %149 = arith.cmpf oge, %147, %148 : vector<4x256xf32>
    %cst_41 = arith.constant 1.000000e-01 : f32
    %150 = vector.broadcast %cst_41 : f32 to vector<4x256xf32>
    %151 = arith.mulf %150, %147 : vector<4x256xf32>
    %152 = arith.select %149, %147, %151 : vector<4x256xi1>, vector<4x256xf32>
    %cst_42 = arith.constant 0.000000e+00 : f32
    %153 = vector.broadcast %cst_42 : f32 to vector<16x256xf32>
    %154 = vector.extract_strided_slice %3 {offsets = [0, 0], sizes = [16, 1], strides = [1, 1]} : vector<16x4xf32> to vector<16x1xf32>
    %155 = vector.extract_strided_slice %152 {offsets = [0, 0], sizes = [1, 256], strides = [1, 1]} : vector<4x256xf32> to vector<1x256xf32>
    %156 = vector.broadcast %154 : vector<16x1xf32> to vector<16x256xf32>
    %157 = vector.broadcast %155 : vector<1x256xf32> to vector<16x256xf32>
    %158 = arith.mulf %156, %157 : vector<16x256xf32>
    %159 = arith.addf %153, %158 : vector<16x256xf32>
    %160 = vector.extract_strided_slice %3 {offsets = [0, 1], sizes = [16, 1], strides = [1, 1]} : vector<16x4xf32> to vector<16x1xf32>
    %161 = vector.extract_strided_slice %152 {offsets = [1, 0], sizes = [1, 256], strides = [1, 1]} : vector<4x256xf32> to vector<1x256xf32>
    %162 = vector.broadcast %160 : vector<16x1xf32> to vector<16x256xf32>
    %163 = vector.broadcast %161 : vector<1x256xf32> to vector<16x256xf32>
    %164 = arith.mulf %162, %163 : vector<16x256xf32>
    %165 = arith.addf %159, %164 : vector<16x256xf32>
    %166 = vector.extract_strided_slice %3 {offsets = [0, 2], sizes = [16, 1], strides = [1, 1]} : vector<16x4xf32> to vector<16x1xf32>
    %167 = vector.extract_strided_slice %152 {offsets = [2, 0], sizes = [1, 256], strides = [1, 1]} : vector<4x256xf32> to vector<1x256xf32>
    %168 = vector.broadcast %166 : vector<16x1xf32> to vector<16x256xf32>
    %169 = vector.broadcast %167 : vector<1x256xf32> to vector<16x256xf32>
    %170 = arith.mulf %168, %169 : vector<16x256xf32>
    %171 = arith.addf %165, %170 : vector<16x256xf32>
    %172 = vector.extract_strided_slice %3 {offsets = [0, 3], sizes = [16, 1], strides = [1, 1]} : vector<16x4xf32> to vector<16x1xf32>
    %173 = vector.extract_strided_slice %152 {offsets = [3, 0], sizes = [1, 256], strides = [1, 1]} : vector<4x256xf32> to vector<1x256xf32>
    %174 = vector.broadcast %172 : vector<16x1xf32> to vector<16x256xf32>
    %175 = vector.broadcast %173 : vector<1x256xf32> to vector<16x256xf32>
    %176 = arith.mulf %174, %175 : vector<16x256xf32>
    %177 = arith.addf %171, %176 : vector<16x256xf32>
    %c0_43 = arith.constant 0 : index
    %c0_44 = arith.constant 0 : index
    %178 = vector.load %arg5[%c0_43, %c0_44] : memref<16x1xf32, #tpu.memory_space<vmem>>, vector<16x1xf32>
    %179 = vector.broadcast %178 : vector<16x1xf32> to vector<16x256xf32>
    %180 = arith.addf %177, %179 : vector<16x256xf32>
    %cst_45 = arith.constant 0.000000e+00 : f32
    %181 = vector.broadcast %cst_45 : f32 to vector<16x256xf32>
    %182 = arith.cmpf oge, %180, %181 : vector<16x256xf32>
    %cst_46 = arith.constant 1.000000e-01 : f32
    %183 = vector.broadcast %cst_46 : f32 to vector<16x256xf32>
    %184 = arith.mulf %183, %180 : vector<16x256xf32>
    %185 = arith.select %182, %180, %184 : vector<16x256xi1>, vector<16x256xf32>
    %c0_47 = arith.constant 0 : index
    %c0_48 = arith.constant 0 : index
    %c0_49 = arith.constant 0 : index
    %186 = vector.load %arg6[%c0_47, %c0_48, %c0_49] : memref<1x16x256xf32, #tpu.memory_space<vmem>>, vector<1x16x256xf32>
    %187 = vector.shape_cast %186 : vector<1x16x256xf32> to vector<16x256xf32>
    %188 = vector.shape_cast %185 : vector<16x256xf32> to vector<1x16x256xf32>
    tpu.vector_store %arg6[%c0_47, %c0_48, %c0_49], %188 {strides = array<i32>} : memref<1x16x256xf32, #tpu.memory_space<vmem>>, vector<1x16x256xf32>,
    return
  }
  func.func @transform_0(%arg0: i32) -> (i32, i32, i32) {
    %c0_i32 = arith.constant 0 : i32
    %c0_i32_0 = arith.constant 0 : i32
    %c0_i32_1 = arith.constant 0 : i32
    return %arg0, %c0_i32, %c0_i32_0 : i32, i32, i32
  }
  func.func @transform_1(%arg0: i32) -> (i32, i32) {
    %c0_i32 = arith.constant 0 : i32
    %c0_i32_0 = arith.constant 0 : i32
    %c0_i32_1 = arith.constant 0 : i32
    return %c0_i32, %c0_i32_0 : i32, i32
  }
  func.func @transform_2(%arg0: i32) -> (i32, i32) {
    %c0_i32 = arith.constant 0 : i32
    %c0_i32_0 = arith.constant 0 : i32
    %c0_i32_1 = arith.constant 0 : i32
    return %c0_i32, %c0_i32_0 : i32, i32
  }
  func.func @transform_3(%arg0: i32) -> (i32, i32) {
    %c0_i32 = arith.constant 0 : i32
    %c0_i32_0 = arith.constant 0 : i32
    %c0_i32_1 = arith.constant 0 : i32
    return %c0_i32, %c0_i32_0 : i32, i32
  }
  func.func @transform_4(%arg0: i32) -> (i32, i32) {
    %c0_i32 = arith.constant 0 : i32
    %c0_i32_0 = arith.constant 0 : i32
    %c0_i32_1 = arith.constant 0 : i32
    return %c0_i32, %c0_i32_0 : i32, i32
  }
  func.func @transform_5(%arg0: i32) -> (i32, i32, i32) {
    %c0_i32 = arith.constant 0 : i32
    %c0_i32_0 = arith.constant 0 : i32
    %c0_i32_1 = arith.constant 0 : i32
    return %arg0, %c0_i32, %c0_i32_0 : i32, i32, i32
  }
}

</mosaic_0001>

<bundles_post_ra>
// kernel: custom_pixel_shuffle_icnr.1
= control target key start
LH: loop header
LB: loop body
LE: loop exit
PB: predicated region body
PF: predicated region fallthrough
CT: control target
= control target key end

     0   :  { %s800_s18 = smov 0   ;;  %s969_s0 = inlined_call_operand.vmem [shape: f32[2,4,290], index: 0, kind: input, shape index: {}]   ;;  %s970_s1 = inlined_call_operand.vmem [shape: f32[4,9], index: 1, kind: input, shape index: {}]   ;;  %s971_s2 = inlined_call_operand.vmem [shape: f32[4,1], index: 2, kind: input, shape index: {}]   ;;  %s972_s3 = inlined_call_operand.vmem [shape: f32[16,4], index: 3, kind: input, shape index: {}]   ;;  %s973_s4 = inlined_call_operand.vmem [shape: f32[16,1], index: 4, kind: input, shape index: {}]   ;;  %s974_s5 = inlined_call_operand.vmem [shape: f32[2,16,256], index: 5, kind: output, shape index: {}]  }
   0x1 LB: > { %s687_s19 = sadd.s32 4294967295, %s750_s18   ;;  %p691_p0 = scmp.ge.s32.totalorder %s750_s18, 1  ;;  %s750_s18 = sphi %s800_s18, %s15_s18  }
   0x2   : > { %p187_p1 = scmp.lt.s32.totalorder %s750_s18, 3 }
   0x4   : > { %p188_p2 = pnand %p691_p0, %p187_p1 }
   0x5   : > { %v227_v0 = vld [vmem:[%s970_s1] sm:$0xf] (!%p188_p2)  ;;  %v752_v1 = vmov (!%p188_p2), 1   ;;  %v753_v2 = vmov (!%p188_p2), 7   ;;  %p215_p3 = scmp.lt.s32.totalorder (!%p188_p2), %s687_s19, 1  ;;  %v754_v3 = vmov (!%p188_p2), 4   ;;  %v230_v13 = vlaneseq (!%p188_p2) }
   0x6   : > { %191 = sbr.rel (%p188_p2) target bundleno = 311 (0x137), region = 40  ;;  %725 = vset.pattern.permute.xlu0 (!%p188_p2), %v752_v1  ;;  %727 = vset.pattern.permute.xlu1 (!%p188_p2), %v753_v2  ;;  %v755_v4 = vmov (!%p188_p2), 0   ;;  %s756_s26 = smov (!%p188_p2), 126   ;;  %v757_v7 = vmov (!%p188_p2), 2   ;;  %v758_v9 = vmov (!%p188_p2), 3   ;;  %v759_v10 = vmov (!%p188_p2), 5  }
   0x7   : > { %284 = vperm.xlu0 (!%p188_p2), %725, %v227_v0   ;;  %439 = vperm.xlu1 (!%p188_p2), %727, %v227_v0   ;;  %s760_s27 = smov (!%p188_p2), 112   ;;  %v761_v11 = vmov (!%p188_p2), 6   ;;  %s762_s28 = smov (!%p188_p2), 110   ;;  %v763_v12 = vmov (!%p188_p2), 8   ;;  %v837_v14 = vand.u32 (!%p188_p2), 127, %v230_v13  ;;  %v228_v18 = vld [vmem:[%s972_s3] sm:$0xff] (!%p188_p2) }
   0x8   : > { %s764_s29 = smov (!%p188_p2), 96   ;;  %s765_s30 = smov (!%p188_p2), 94   ;;  %v488_v15 = vld [vmem:[%s971_s2] sm:$0xf] (!%p188_p2)  ;;  %v229_v20 = vld [vmem:[%s972_s3 + $0x8] sm:$0xff] (!%p188_p2)  ;;  %v864_v25 = vshrl.u32 (!%p188_p2), %v230_v13, 7 }
   0x9   : > { %v843_v16 = vadd.s32 (!%p188_p2), 128, %v837_v14  ;;  %v766_v22 = vmov (!%p188_p2), 839922192   ;;  %s767_s12 = smov (!%p188_p2), 127   ;;  %s768_s13 = smov (!%p188_p2), 111   ;;  %v601_v42 = vld [vmem:[%s973_s4 + $0x8] sm:$0xff] (!%p188_p2) }
   0xa   : > { %v287_v23 = vunpack.c.l.s4 (!%p188_p2), %v766_v22  ;;  %s769_s14 = smov (!%p188_p2), 95   ;;  %v600_v44 = vld [vmem:[%s973_s4] sm:$0xff] (!%p188_p2)  ;;  %v237_v2 = vand.u32 (!%p188_p2), 15, %v837_v14  ;;  %vm331_vm1 = vcmask (!%p188_p2), 1031168   ;;  %vm352_vm3 = vcmask (!%p188_p2), 916480  }
   0xb   : > { %726 = vset.pattern.permute.xlu0 (!%p188_p2), %v754_v3  ;;  %728 = vset.pattern.permute.xlu1 (!%p188_p2), %v755_v4  ;;  %v244_v17 = vand.u32 (!%p188_p2), 15, %v843_v16  ;;  %vm305_vm6 = vcmask (!%p188_p2), 1039360   ;;  %vm402_vm7 = vcmask (!%p188_p2), 900096   ;;  %vm423_vm8 = vcmask (!%p188_p2), 785408  }
   0xc   : > { %368 = vperm.xlu0 (!%p188_p2), %726, %v227_v0   ;;  %276 = vperm.xlu1 (!%p188_p2), %728, %v227_v0   ;;  %v288_v24 = vunpack.c.0.s8 (!%p188_p2), %v287_v23  ;;  %v257_v3 = vadd.s32 (!%p188_p2), 4294967295, %v237_v2  ;;  %vm389_vm9 = vcmask (!%p188_p2), 908288   ;;  %vm473_vm10 = vcmask (!%p188_p2), 769024  }
   0xd   : > { %s976_s19 = smov (!%p215_p3, %s687_s19), 1  ;;  %v852_v19 = vadd.s32 4294967295, %v244_v17  ;;  %vm460_vm11 = vcmask 777216  }
   0xe   : > { %s698_s22 = smul.u32 12, %s976_s19  ;;  %v291_v26 = vsub.s32 %v288_v24, %v864_v25  ;;  %vm259_vm2 = vcmp.ge.s32.totalorder %v257_v3, 0  ;;  %s697_s21 = sshll.u32 %s976_s19, 5 }
   0xf   : > { %vm260_vm0 = vcmp.ge.s32.totalorder %v852_v19, 0  ;;  %s224_s24 = scalar_lea.vmem %s974_s5, %s697_s21 }
  0x10   : > { %s219_s25 = scalar_lea.vmem %s969_s0, %s698_s22  ;;  %729 = vset.pattern.permute.xlu1 %v757_v7  ;;  %730 = vset.pattern.permute.xlu0 %v758_v9 }
  0x11   : > { %v819_v5 = vld [vmem:[%s219_s25] sm:$0xff]  ;;  %v824_v8 = vld [vmem:[%s219_s25 + $0x8] sm:$0xf] }
  0x12   : > { %v270_v6 = vcombine.high %v819_v5, %v819_v5  ;;  %325 = vrot.lane.b32.xlu0 %v819_v5, %s756_s26 }
  0x14   : > { %327 = vrot.lane.b32.xlu1 %v270_v6, %s756_s26  ;;  %v860_v21 = vsel %vm260_vm0, %v270_v6, 0.0 }
  0x16   : > { %329 = vrot.lane.b32.xlu0 %v824_v8, %s756_s26 }
  0x18   : > { %339 = vperm.xlu1 %729, %v227_v0  }
  0x1a   : > { %360 = vperm.xlu0 %730, %v227_v0  }
  0x1c   : > { %731 = vset.pattern.permute.xlu1 %v759_v10 }
  0x1d   : > { %410 = vperm.xlu1 %731, %v227_v0  }
  0x1e   : > { %348 = vrot.lane.b32.xlu0 %v270_v6, %s760_s27 }
  0x1f   : > { %732 = vset.pattern.permute.xlu0 %v761_v11  ;;  %v272_v11 = vsel %vm259_vm2, %v819_v5, 0.0 }
  0x21   : > { %346 = vrot.lane.b32.xlu1 %v819_v5, %s760_s27 }
  0x22   : > { %734 = vset.pattern.permute.xlu1 %v755_v4  ;;  %431 = vperm.xlu0 %732, %v227_v0  }
  0x25   : > { %350 = vrot.lane.b32.xlu1 %v824_v8, %s760_s27 }
  0x26   : > { %400 = vrot.lane.b32.xlu0 %v824_v8, %s762_s28 }
  0x27   : > { %733 = vset.pattern.permute.xlu0 %v763_v12 }
  0x29   : > { %396 = vrot.lane.b32.xlu1 %v819_v5, %s762_s28 }
  0x2a   : > { %481 = vperm.xlu0 %733, %v227_v0  }
  0x2d   : > { %398 = vrot.lane.b32.xlu1 %v270_v6, %s762_s28 }
  0x2e   : > { %421 = vrot.lane.b32.xlu0 %v824_v8, %s764_s29 }
  0x2f   : > { %735 = vset.pattern.permute.xlu0 %v755_v4 }
  0x31   : > { %417 = vrot.lane.b32.xlu1 %v819_v5, %s764_s29 }
  0x32   : > { %467 = vrot.lane.b32.xlu0 %v819_v5, %s765_s30 }
  0x35   : > { %419 = vrot.lane.b32.xlu1 %v270_v6, %s764_s29 }
  0x36   : > { %471 = vrot.lane.b32.xlu0 %v824_v8, %s765_s30 }
  0x39   : > { %491 = vperm.xlu1 %734, %v488_v15  }
  0x3a   : > { %504 = vperm.xlu0 %735, %v228_v18  }
  0x3d   : > { %469 = vrot.lane.b32.xlu1 %v270_v6, %s765_s30  ;;  %v898_v6 = vadd.s32 1, %v237_v2 }
  0x3e   : > { %737 = vset.pattern.permute.xlu0 %v752_v1 }
  0x3f   : > { %vm316_vm4 = vcmp.lt.s32.totalorder %v898_v6, 16 }
  0x41   : > { %509 = vperm.xlu1 %734, %v229_v20  }
  0x45   : > { %736 = vset.pattern.permute.xlu1 %v752_v1 }
  0x46   : > { %529 = vperm.xlu1 %736, %v228_v18  }
  0x4a   : > { %738 = vset.pattern.permute.xlu1 %v757_v7 }
  0x86   : > { %v285_v27 = vpop.permute.xlu0 %284  ;;  %v440_v29 = vpop.permute.xlu1 %439 }
  0x87   : > { %v292_v28 = vrot.slane %v285_v27, %v291_v26  ;;  %v447_v31 = vrot.slane %v440_v29, %v291_v26 }
  0x89   : > { %v294_v30 = vmul.f32 %v292_v28, %v819_v5  ;;  %v295_v35 = vmul.f32 %v292_v28, %v824_v8  ;;  %v449_v37 = vmul.f32 %v447_v31, %v819_v5  ;;  %v450_v41 = vmul.f32 %v447_v31, %v824_v8 }
  0x8b   : > { %v369_v32 = vpop.permute.xlu0 %368  ;;  %299 = vrot.lane.b32.xlu1 %v294_v30, %s767_s12  ;;  %v298_v33 = vcombine.high %v294_v30, %v294_v30  ;;  %v453_v39 = vcombine.high %v449_v37, %v449_v37  ;;  %v277_v43 = vpop.permute.xlu1 %276 }
  0x8c   : > { %v376_v34 = vrot.slane %v369_v32, %v291_v26 }
  0x8d   : > { %301 = vrot.lane.b32.xlu0 %v298_v33, %s767_s12 }
  0x8e   : > { %v378_v36 = vmul.f32 %v376_v34, %v819_v5  ;;  %v379_v40 = vmul.f32 %v376_v34, %v824_v8  ;;  %v904_v8 = vadd.s32 1, %v244_v17  ;;  %v279_v17 = vmul.f32 %v277_v43, %v272_v11 }
  0x8f   : > { %303 = vrot.lane.b32.xlu1 %v295_v35, %s767_s12  ;;  %v328_v45 = vpop.permute.xlu1 %327  ;;  %v326_v48 = vpop.permute.xlu0 %325 }
  0x90   : > { %v382_v38 = vcombine.high %v378_v36, %v378_v36  ;;  %v332_v10 = vsel %vm331_vm1, %v326_v48, %v328_v45  ;;  %vm317_vm5 = vcmp.lt.s32.totalorder %v904_v8, 16  ;;  %v514_v8 = vsub.s32 0, %v864_v25 }
  0x91   : > { %v336_v15 = vsel %vm316_vm4, %v332_v10, 0.0 }
  0x92   : > { %385 = vrot.lane.b32.xlu0 %v382_v38, %s768_s13 }
  0x93   : > { %383 = vrot.lane.b32.xlu1 %v378_v36, %s768_s13  ;;  %v330_v50 = vpop.permute.xlu0 %329 }
  0x94   : > { %v333_v12 = vsel %vm331_vm1, %v328_v45, %v330_v50 }
  0x95   : > { %v337_v22 = vsel %vm317_vm5, %v333_v12, 0.0 }
  0x96   : > { %456 = vrot.lane.b32.xlu0 %v453_v39, %s769_s14 }
  0x97   : > { %387 = vrot.lane.b32.xlu1 %v379_v40, %s768_s13  ;;  %v340_v46 = vpop.permute.xlu1 %339 }
  0x98   : > { %v342_v24 = vmul.f32 %v340_v46, %v336_v15 }
  0x99   : > { %v361_v52 = vpop.permute.xlu0 %360 }
  0x9a   : > { %533 = vperm.xlu0 %737, %v229_v20  }
  0x9b   : > { %454 = vrot.lane.b32.xlu1 %v449_v37, %s769_s14 }
  0x9c   : > { %v883_v47 = vpop.permute.xlu1 %410 }
  0x9d   : > { %v349_v54 = vpop.permute.xlu0 %348 }
  0x9e   : > { %739 = vset.pattern.permute.xlu0 %v758_v9 }
  0x9f   : > { %577 = vperm.xlu0 %739, %v228_v18   ;;  %458 = vrot.lane.b32.xlu1 %v450_v41, %s769_s14 }
  0xa0   : > { %v347_v49 = vpop.permute.xlu1 %346 }
  0xa1   : > { %v885_v56 = vpop.permute.xlu0 %431  ;;  %v353_v13 = vsel %vm352_vm3, %v347_v49, %v349_v54 }
  0xa2   : > { %v357_v5 = vsel %vm259_vm2, %v353_v13, 0.0 }
  0xa3   : > { %553 = vperm.xlu1 %738, %v228_v18   ;;  %742 = vset.pattern.permute.xlu0 %v755_v4  ;;  %v363_v31 = vmul.f32 %v361_v52, %v357_v5  ;;  %v538_v5 = vsub.s32 1, %v864_v25 }
  0xa4   : > { %609 = vperm.xlu0 %742, %v601_v42   ;;  %v351_v51 = vpop.permute.xlu1 %350 }
  0xa5   : > { %v401_v58 = vpop.permute.xlu0 %400  ;;  %v354_v16 = vsel %vm352_vm3, %v349_v54, %v351_v51 }
  0xa6   : > { %v358_v26 = vsel %vm260_vm0, %v354_v16, 0.0 }
  0xa7   : > { %557 = vperm.xlu1 %738, %v229_v20   ;;  %v364_v34 = vmul.f32 %v361_v52, %v358_v26 }
  0xa8   : > { %v397_v53 = vpop.permute.xlu1 %396 }
  0xa9   : > { %v887_v59 = vpop.permute.xlu0 %481 }
  0xab   : > { %740 = vset.pattern.permute.xlu1 %v758_v9 }
  0xac   : > { %581 = vperm.xlu1 %740, %v229_v20   ;;  %v399_v55 = vpop.permute.xlu1 %398  ;;  %v280_v20 = vmul.f32 %v277_v43, %v860_v21  ;;  %v343_v21 = vmul.f32 %v340_v46, %v337_v22 }
  0xad   : > { %v422_v62 = vpop.permute.xlu0 %421  ;;  %v403_v27 = vsel %vm402_vm7, %v397_v53, %v399_v55  ;;  %v404_v37 = vsel %vm402_vm7, %v399_v55, %v401_v58 }
  0xae   : > { %v407_v35 = vsel %vm316_vm4, %v403_v27, 0.0  ;;  %v408_v48 = vsel %vm317_vm5, %v404_v37, 0.0  ;;  %v562_v27 = vsub.s32 2, %v864_v25 }
  0xaf   : > { %v413_v43 = vmul.f32 %v883_v47, %v407_v35  ;;  %v414_v55 = vmul.f32 %v883_v47, %v408_v48 }
  0xb0   : > { %741 = vset.pattern.permute.xlu1 %v755_v4  ;;  %v418_v57 = vpop.permute.xlu1 %417 }
  0xb1   : > { %604 = vperm.xlu1 %741, %v600_v44   ;;  %v468_v0 = vpop.permute.xlu0 %467 }
  0xb4   : > { %v420_v60 = vpop.permute.xlu1 %419 }
  0xb5   : > { %v896_v4 = vpop.permute.xlu0 %471  ;;  %v424_v38 = vsel %vm423_vm8, %v418_v57, %v420_v60  ;;  %v425_v44 = vsel %vm423_vm8, %v420_v60, %v422_v62 }
  0xb6   : > { %v428_v49 = vsel %vm259_vm2, %v424_v38, 0.0  ;;  %v429_v53 = vsel %vm260_vm0, %v425_v44, 0.0 }
  0xb7   : > { %v434_v57 = vmul.f32 %v885_v56, %v428_v49  ;;  %v435_v2 = vmul.f32 %v885_v56, %v429_v53 }
  0xb8   : > { %v889_v61 = vpop.permute.xlu1 %491 }
  0xb9   : > { %v906_v9 = vpop.permute.xlu0 %504 }
  0xbc   : > { %v891_v63 = vpop.permute.xlu1 %469 }
  0xbd   : > { %v474_v50 = vsel %vm473_vm10, %v468_v0, %v891_v63  ;;  %v475_v0 = vsel %vm473_vm10, %v891_v63, %v896_v4 }
  0xbe   : > { %v478_v62 = vsel %vm316_vm4, %v474_v50, 0.0 }
  0xbf   : > { %v484_v47 = vmul.f32 %v887_v59, %v478_v62 }
  0xc0   : > { %v893_v1 = vpop.permute.xlu1 %509 }
  0xc5   : > { %v900_v7 = vpop.permute.xlu1 %529 }
  0xfd   : > { %v300_v14 = vpop.permute.xlu1 %299 }
  0xff   : > { %v302_v18 = vpop.permute.xlu0 %301 }
 0x100   : > { %v306_v23 = vsel %vm305_vm6, %v300_v14, %v302_v18  ;;  %v479_v14 = vsel %vm317_vm5, %v475_v0, 0.0 }
 0x101   : > { %v310_v28 = vadd.f32 %v306_v23, %v279_v17  ;;  %v304_v29 = vpop.permute.xlu1 %303  ;;  %v485_v56 = vmul.f32 %v887_v59, %v479_v14 }
 0x102   : > { %v307_v30 = vsel %vm305_vm6, %v302_v18, %v304_v29 }
 0x103   : > { %v344_v32 = vadd.f32 %v342_v24, %v310_v28  ;;  %v311_v33 = vadd.f32 %v307_v30, %v280_v20 }
 0x104   : > { %v386_v36 = vpop.permute.xlu0 %385 }
 0x105   : > { %v345_v39 = vadd.f32 %v343_v21, %v311_v33  ;;  %v365_v40 = vadd.f32 %v363_v31, %v344_v32  ;;  %v384_v41 = vpop.permute.xlu1 %383  ;;  %v586_v31 = vsub.s32 3, %v864_v25 }
 0x106   : > { %v390_v42 = vsel %vm389_vm9, %v384_v41, %v386_v36 }
 0x107   : > { %v394_v45 = vadd.f32 %v390_v42, %v365_v40  ;;  %v366_v46 = vadd.f32 %v364_v34, %v345_v39 }
 0x108   : > { %v457_v60 = vpop.permute.xlu0 %456 }
 0x109   : > { %v415_v51 = vadd.f32 %v413_v43, %v394_v45  ;;  %v388_v52 = vpop.permute.xlu1 %387 }
 0x10a   : > { %v391_v54 = vsel %vm389_vm9, %v386_v36, %v388_v52 }
 0x10b   : > { %v395_v58 = vadd.f32 %v391_v54, %v366_v46  ;;  %v436_v3 = vadd.f32 %v434_v57, %v415_v51 }
 0x10d   : > { %v416_v19 = vadd.f32 %v414_v55, %v395_v58  ;;  %v455_v10 = vpop.permute.xlu1 %454 }
 0x10e   : > { %v461_v11 = vsel %vm460_vm11, %v455_v10, %v457_v60 }
 0x10f   : > { %v465_v12 = vadd.f32 %v461_v11, %v436_v3  ;;  %v437_v13 = vadd.f32 %v435_v2, %v416_v19 }
 0x111   : > { %v486_v15 = vadd.f32 %v484_v47, %v465_v12  ;;  %v459_v6 = vpop.permute.xlu1 %458 }
 0x112   : > { %v462_v16 = vsel %vm460_vm11, %v457_v60, %v459_v6 }
 0x113   : > { %v466_v17 = vadd.f32 %v462_v16, %v437_v13  ;;  %v494_v18 = vadd.f32 %v889_v61, %v486_v15 }
 0x115   : > { %v487_v63 = vadd.f32 %v485_v56, %v466_v17  ;;  %v498_v20 = vmul.f32 0.1, %v494_v18  ;;  %vm496_vm12 = vcmp.ge.f32.partialorder %v494_v18, 0.0 }
 0x117   : > { %v495_v4 = vadd.f32 %v889_v61, %v487_v63  ;;  %v500_v23 = vsel %vm496_vm12, %v494_v18, %v498_v20 }
 0x118   : > { %v539_v26 = vrot.slane %v500_v23, %v538_v5  ;;  %v515_v59 = vrot.slane %v500_v23, %v514_v8  ;;  %v563_v32 = vrot.slane %v500_v23, %v562_v27 }
 0x119   : > { %v499_v22 = vmul.f32 0.1, %v495_v4  ;;  %vm497_vm13 = vcmp.ge.f32.partialorder %v495_v4, 0.0  ;;  %v534_v21 = vpop.permute.xlu0 %533 }
 0x11a   : > { %v544_v61 = vmul.f32 %v539_v26, %v900_v7  ;;  %v520_v34 = vmul.f32 %v515_v59, %v906_v9  ;;  %v522_v37 = vmul.f32 %v515_v59, %v893_v1  ;;  %v546_v39 = vmul.f32 %v539_v26, %v534_v21 }
 0x11b   : > { %v501_v24 = vsel %vm497_vm13, %v495_v4, %v499_v22 }
 0x11c   : > { %v519_v28 = vrot.slane %v501_v24, %v514_v8  ;;  %v543_v29 = vrot.slane %v501_v24, %v538_v5  ;;  %v567_v36 = vrot.slane %v501_v24, %v562_v27  ;;  %v591_v46 = vrot.slane %v501_v24, %v586_v31 }
 0x11d   : > { %v548_v48 = vadd.f32 %v544_v61, %v520_v34  ;;  %v550_v49 = vadd.f32 %v546_v39, %v522_v37 }
 0x11e   : > { %v545_v33 = vmul.f32 %v543_v29, %v900_v7  ;;  %v521_v35 = vmul.f32 %v519_v28, %v906_v9  ;;  %v523_v38 = vmul.f32 %v519_v28, %v893_v1  ;;  %v547_v40 = vmul.f32 %v543_v29, %v534_v21  ;;  %v578_v25 = vpop.permute.xlu0 %577 }
 0x11f   : > { %v587_v9 = vrot.slane %v500_v23, %v586_v31  ;;  %v593_v60 = vmul.f32 %v591_v46, %v578_v25 }
 0x120   : > { %v549_v7 = vadd.f32 %v545_v33, %v521_v35  ;;  %v551_v50 = vadd.f32 %v547_v40, %v523_v38 }
 0x121   : > { %v592_v58 = vmul.f32 %v587_v9, %v578_v25 }
 0x122   : > { %v554_v30 = vpop.permute.xlu1 %553 }
 0x123   : > { %v568_v42 = vmul.f32 %v563_v32, %v554_v30  ;;  %v569_v43 = vmul.f32 %v567_v36, %v554_v30  ;;  %v610_v62 = vpop.permute.xlu0 %609 }
 0x125   : > { %v572_v51 = vadd.f32 %v568_v42, %v548_v48  ;;  %v573_v52 = vadd.f32 %v569_v43, %v549_v7 }
 0x126   : > { %v558_v41 = vpop.permute.xlu1 %557 }
 0x127   : > { %v570_v44 = vmul.f32 %v563_v32, %v558_v41  ;;  %v571_v45 = vmul.f32 %v567_v36, %v558_v41  ;;  %v596_v19 = vadd.f32 %v592_v58, %v572_v51  ;;  %v597_v3 = vadd.f32 %v593_v60, %v573_v52 }
 0x129   : > { %v574_v54 = vadd.f32 %v570_v44, %v550_v49  ;;  %v575_v1 = vadd.f32 %v571_v45, %v551_v50 }
 0x12b   : > { %v582_v53 = vpop.permute.xlu1 %581 }
 0x12c   : > { %v594_v55 = vmul.f32 %v587_v9, %v582_v53  ;;  %v595_v57 = vmul.f32 %v591_v46, %v582_v53 }
 0x12e   : > { %v598_v2 = vadd.f32 %v594_v55, %v574_v54  ;;  %v599_v0 = vadd.f32 %v595_v57, %v575_v1 }
 0x130   : > { %v614_v10 = vadd.f32 %v610_v62, %v598_v2  ;;  %v615_v11 = vadd.f32 %v610_v62, %v599_v0  ;;  %v605_v47 = vpop.permute.xlu1 %604 }
 0x131   : > { %v612_v12 = vadd.f32 %v605_v47, %v596_v19  ;;  %v613_v13 = vadd.f32 %v605_v47, %v597_v3 }
 0x132   : > { %vm618_vm14 = vcmp.ge.f32.partialorder %v614_v10, 0.0  ;;  %vm619_vm15 = vcmp.ge.f32.partialorder %v615_v11, 0.0  ;;  %v622_v14 = vmul.f32 0.1, %v614_v10  ;;  %v623_v15 = vmul.f32 0.1, %v615_v11 }
 0x133   : > { %vm616_vm0 = vcmp.ge.f32.partialorder %v612_v12, 0.0  ;;  %vm617_vm1 = vcmp.ge.f32.partialorder %v613_v13, 0.0  ;;  %v620_v6 = vmul.f32 0.1, %v612_v12  ;;  %v621_v16 = vmul.f32 0.1, %v613_v13 }
 0x134   : > { %v626_v56 = vsel %vm618_vm14, %v614_v10, %v622_v14  ;;  %v627_v17 = vsel %vm619_vm15, %v615_v11, %v623_v15 }
 0x135   : > { %630 = vst [vmem:[%s224_s24 + $0x10] sm:$0xff] %v626_v56  ;;  %631 = vst [vmem:[%s224_s24 + $0x18] sm:$0xff] %v627_v17  ;;  %v624_v18 = vsel %vm616_vm0, %v612_v12, %v620_v6  ;;  %v625_v63 = vsel %vm617_vm1, %v613_v13, %v621_v16 }
 0x136   : > { %628 = vst [vmem:[%s224_s24] sm:$0xff] %v624_v18  ;;  %629 = vst [vmem:[%s224_s24 + $0x8] sm:$0xff] %v625_v63 }
 0x137 PF: > { %s15_s18 = sadd.s32 1, %s750_s18  }
 0x138   : > { %p12_p4 = scmp.ge.s32.totalorder %s15_s18, 4  }
 0x13a   :  { %14 = sbr.rel (!%p12_p4) target bundleno = 1 (0x1), region = 70 }

</bundles_post_ra>
